<compile_context>
chip_gen: v7x
topology: tpu7x:2x2x1
jax: 0.10.0
libtpu: 0.0.40
codegen_flags: <defaults>
</compile_context>

<pallas_src>
from typing import List

import jax
import jax.numpy as jnp
from jax import lax
from jax.experimental import pallas as pl
from jax.experimental.pallas import tpu as pltpu


def _round_up(x: int, m: int) -> int:
    return ((x + m - 1) // m) * m


def _make_kernel(num_layers: int, enc: int, gdim: int, compute_dtype):
    """Ref order:
       num_layers == 1 : s, g, w_s(1,enc), w_g(1,gdim), b(1,1), out(1,TB)
       num_layers  > 1 : s, g, W0, b0, (W_i, b_i)*, w_last(1,H), b_last(1,1),
                         out(1,TB), cat_scratch(TB, enc+gdim)
    """
    dnum = (((1,), (1,)), ((), ()))  # contract axis-1 of both operands

    def kernel(*refs):
        if num_layers == 1:
            s_ref, g_ref, ws_ref, wg_ref, b_ref, out_ref = refs
            s = s_ref[...].astype(jnp.float32)
            g = g_ref[...].astype(jnp.float32)
            val = (lax.dot_general(ws_ref[...], s, dnum,
                                   preferred_element_type=jnp.float32)
                   + lax.dot_general(wg_ref[...], g, dnum,
                                     preferred_element_type=jnp.float32)
                   + b_ref[...])
            out_ref[...] = val.astype(out_ref.dtype)
            return

        s_ref, g_ref = refs[0], refs[1]
        out_ref, cat_ref = refs[-2], refs[-1]
        p = refs[2:-2]

        # ---- Layer 0: fused concat in VMEM, one MXU matmul ---------------
        cat_ref[:, :enc] = s_ref[...].astype(compute_dtype)
        cat_ref[:, enc:] = g_ref[...].astype(compute_dtype)
        w0 = p[0][...]                         # (enc+gdim, h0) compute_dtype
        b0 = p[1][...]                         # (1, h0)        f32
        h = jnp.dot(cat_ref[...], w0, preferred_element_type=jnp.float32) + b0
        h = jnp.maximum(h, 0.0)

        off = 2
        for _ in range(1, num_layers - 1):
            w = p[off][...]                    # (in, out) compute_dtype
            b = p[off + 1][...]                # (1, out)  f32
            off += 2
            h = jnp.dot(h.astype(w.dtype), w,
                        preferred_element_type=jnp.float32) + b
            h = jnp.maximum(h, 0.0)

        # ---- Final Linear(hidden -> 1), f32, lane-dense (1, TB) row ------
        w_row = p[off][...]                    # (1, H_last) f32
        b_last = p[off + 1][...]               # (1, 1)      f32
        val = lax.dot_general(w_row, h, dnum,
                              preferred_element_type=jnp.float32) + b_last
        out_ref[...] = val.astype(out_ref.dtype)

    return kernel


def _pick_block_batch(B, enc, gdim, params, compute_dtype, vmem_budget):
    w_isz = jnp.dtype(compute_dtype).itemsize
    weight_bytes = sum(int(w.size) * w_isz + int(b.size) * 4 for w, b in params)
    max_width = max([enc + gdim] + [int(w.shape[1]) for w, _ in params])

    def tile_bytes(tb):
        return (2 * tb * (enc + gdim) * 4        # double-buffered f32 input blocks
                + 2 * weight_bytes               # VMEM-resident weights (x2 bufs)
                + 2 * tb * max_width * 4         # live f32 activation tiles
                + tb * (enc + gdim) * w_isz      # concat scratch
                + 2 * 2 * tb * 4)                # packed (1, TB) output blocks

    if B <= 256:
        return B                                 # one full-array block, no padding
    # >= 2 grid steps so both v7x TensorCores get work; 1024 cap per v6e sweep.
    tb = min(1024, _round_up(pl.cdiv(B, 2), 128))
    while tb > 128 and tile_bytes(tb) > vmem_budget:
        tb -= 128
    return tb


def value_intrinsic_critic_forward(encoded_state, goal, params, *,
                                   compute_dtype=jnp.bfloat16,
                                   block_batch=None):
    """Forward pass of ValueIntrinsicCritic.

    encoded_state: (B, encoder_dim), goal: (B, goal_dim)  (f32 or bf16)
    params: list of (W, b) with W shape (in, out), b shape (out,)
    Hidden layers run on the MXU in `compute_dtype` (pass jnp.float32 for full
    precision); the final Linear(hidden -> 1) always runs in f32.
    returns: (B, 1) float32
    """
    B, enc = encoded_state.shape
    Bg, gdim = goal.shape
    assert Bg == B
    num_layers = len(params)

    try:
        vmem_cap = int(pltpu.get_tpu_info().vmem_capacity_bytes)
    except Exception:
        vmem_cap = 64 * 1024 * 1024              # conservative (v7x per-core)
    vmem_limit = min(32 * 1024 * 1024, vmem_cap // 2)

    if block_batch is not None:
        TB = block_batch
    else:
        TB = _pick_block_batch(B, enc, gdim, params, compute_dtype,
                               int(vmem_limit * 0.55))
    grid = (pl.cdiv(B, TB),)

    flat_inputs = [encoded_state, goal]
    in_specs = [
        pl.BlockSpec((TB, enc), lambda i: (i, 0)),
        pl.BlockSpec((TB, gdim), lambda i: (i, 0)),
    ]

    def add_const(arr):
        # Constant block index -> weights/biases stay VMEM-resident across steps.
        flat_inputs.append(arr)
        in_specs.append(pl.BlockSpec(arr.shape, lambda i: (0, 0)))

    w0, b0 = params[0]
    if num_layers == 1:
        # Single Linear(enc+goal -> 1): pure f32 (no quantization).
        add_const(w0[:enc].T.astype(jnp.float32))            # (1, enc)
        add_const(w0[enc:].T.astype(jnp.float32))            # (1, goal)
        add_const(b0.reshape(1, 1).astype(jnp.float32))      # (1, 1)
        scratch_shapes = []
    else:
        add_const(w0.astype(compute_dtype))                  # (enc+goal, h0)
        add_const(b0.reshape(1, -1).astype(jnp.float32))     # (1, h0)
        for li in range(1, num_layers - 1):
            w, b = params[li]
            add_const(w.astype(compute_dtype))               # (in, out)
            add_const(b.reshape(1, -1).astype(jnp.float32))  # (1, out)
        wl, bl = params[-1]
        add_const(wl.T.astype(jnp.float32))                  # (1, H_last) f32
        add_const(bl.reshape(1, 1).astype(jnp.float32))      # (1, 1)
        scratch_shapes = [pltpu.VMEM((TB, enc + gdim), compute_dtype)]

    # Advisory cost estimate for XLA scheduling around the kernel.
    dims = [enc + gdim] + [int(w.shape[1]) for w, _ in params]
    flops = 2 * B * sum(dims[i] * dims[i + 1] for i in range(len(dims) - 1))
    w_isz = jnp.dtype(compute_dtype).itemsize
    weight_bytes = sum(int(w.size) * w_isz + int(b.size) * 4 for w, b in params)
    bytes_accessed = (B * (enc + gdim) * encoded_state.dtype.itemsize
                      + weight_bytes + B * 4)
    cost = pl.CostEstimate(flops=int(flops), transcendentals=0,
                           bytes_accessed=int(bytes_accessed))

    kernel = _make_kernel(num_layers, enc, gdim, compute_dtype)

    out = pl.pallas_call(
        kernel,
        out_shape=jax.ShapeDtypeStruct((1, B), jnp.float32),
        grid_spec=pltpu.PrefetchScalarGridSpec(
            num_scalar_prefetch=0,
            grid=grid,
            in_specs=in_specs,
            out_specs=pl.BlockSpec((1, TB), lambda i: (0, i)),
            scratch_shapes=scratch_shapes),
        compiler_params=pltpu.CompilerParams(
            dimension_semantics=("parallel",),
            vmem_limit_bytes=vmem_limit),
        cost_estimate=cost,
    )(*flat_inputs)

    # (1, B) lane-dense row -> (B, 1) column (order-preserving, trivial reshape).
    return out.reshape(B, 1)


def init_params(key, encoder_dim: int, goal_dim: int, hidden_units: List[int]):
    """Deterministic init mimicking nn.Linear defaults (uniform +/- 1/sqrt(fan_in))."""
    dims = [encoder_dim + goal_dim] + list(hidden_units) + [1]
    params = []
    for i in range(len(dims) - 1):
        key, kw, kb = jax.random.split(key, 3)
        fan_in, fan_out = dims[i], dims[i + 1]
        bound = 1.0 / (float(fan_in) ** 0.5)
        w = jax.random.uniform(kw, (fan_in, fan_out), jnp.float32, -bound, bound)
        b = jax.random.uniform(kb, (fan_out,), jnp.float32, -bound, bound)
        params.append((w, b))
    return params


def reference_forward(encoded_state, goal, params, compute_dtype=jnp.bfloat16):
    """Pure-JAX reference matching the kernel's precision choices
    (compute_dtype MXU operands with f32 accumulation; final layer in f32)."""
    h = jnp.concatenate([encoded_state, goal], axis=-1)
    L = len(params)
    for i, (w, b) in enumerate(params):
        if i < L - 1:
            h = jnp.dot(h.astype(compute_dtype), w.astype(compute_dtype),
                        preferred_element_type=jnp.float32) + b
            h = jnp.maximum(h, 0.0)
        else:
            h = jnp.dot(h.astype(jnp.float32), w.astype(jnp.float32),
                        preferred_element_type=jnp.float32) + b
    return h


if __name__ == "__main__":
    encoder_dim = 32
    goal_dim = 16
    hidden_units = [64, 32]

    key = jax.random.PRNGKey(0)
    key, k_s, k_g = jax.random.split(key, 3)
    params = init_params(key, encoder_dim, goal_dim, hidden_units)

    # Small batch: single grid step, blocks equal the full arrays.
    batch = 8
    encoded_state = jax.random.normal(k_s, (batch, encoder_dim), jnp.float32)
    goal = jax.random.normal(k_g, (batch, goal_dim), jnp.float32)
    out = jax.block_until_ready(
        value_intrinsic_critic_forward(encoded_state, goal, params))
    ref = reference_forward(encoded_state, goal, params)
    assert out.shape == (batch, 1), out.shape
    assert jnp.allclose(out, ref, atol=2e-3, rtol=2e-3), (out, ref)

    # Larger batch: exercises grid > 1 (both v7x TensorCores), lane-dense
    # 128-multiple output blocks, and a partial final block with no jnp.pad.
    batch2 = 272
    key, k_s2, k_g2 = jax.random.split(key, 3)
    s2 = jax.random.normal(k_s2, (batch2, encoder_dim), jnp.float32)
    g2 = jax.random.normal(k_g2, (batch2, goal_dim), jnp.float32)
    out2 = jax.block_until_ready(
        value_intrinsic_critic_forward(s2, g2, params))
    ref2 = reference_forward(s2, g2, params)
    assert out2.shape == (batch2, 1), out2.shape
    assert jnp.allclose(out2, ref2, atol=2e-3, rtol=2e-3), (out2, ref2)

    print("KERNEL_OK")
</pallas_src>

<mosaic_0001>
module attributes {stable_mosaic.version = 11 : i64} {
  func.func @kernel(%arg0: i32, %arg1: memref<8x32xf32, #tpu.memory_space<vmem>>, %arg2: memref<8x16xf32, #tpu.memory_space<vmem>>, %arg3: memref<48x64xbf16, #tpu.memory_space<vmem>>, %arg4: memref<1x64xf32, #tpu.memory_space<vmem>>, %arg5: memref<64x32xbf16, #tpu.memory_space<vmem>>, %arg6: memref<1x32xf32, #tpu.memory_space<vmem>>, %arg7: memref<1x32xf32, #tpu.memory_space<vmem>>, %arg8: memref<1x1xf32, #tpu.memory_space<vmem>>, %arg9: memref<1x8xf32, #tpu.memory_space<vmem>>, %arg10: memref<8x48xbf16, #tpu.memory_space<vmem>>) attributes {dimension_semantics = [#tpu.dimension_semantics<parallel>], iteration_bounds = array<i64: 1>, scalar_prefetch = 0 : i64, scratch_operands = 1 : i64, tpu.core_type = #tpu.core_type<tc>, window_params = [{transform_indices = @transform_0, window_bounds = array<i64: 8, 32>}, {transform_indices = @transform_1, window_bounds = array<i64: 8, 16>}, {pipeline_mode = #tpu.pipeline_mode<synchronous>, transform_indices = @transform_2, window_bounds = array<i64: 48, 64>}, {pipeline_mode = #tpu.pipeline_mode<synchronous>, transform_indices = @transform_3, window_bounds = array<i64: 1, 64>}, {pipeline_mode = #tpu.pipeline_mode<synchronous>, transform_indices = @transform_4, window_bounds = array<i64: 64, 32>}, {pipeline_mode = #tpu.pipeline_mode<synchronous>, transform_indices = @transform_5, window_bounds = array<i64: 1, 32>}, {pipeline_mode = #tpu.pipeline_mode<synchronous>, transform_indices = @transform_6, window_bounds = array<i64: 1, 32>}, {pipeline_mode = #tpu.pipeline_mode<synchronous>, transform_indices = @transform_7, window_bounds = array<i64: 1, 1>}, {transform_indices = @transform_8, window_bounds = array<i64: 1, 8>}]} {
    %c0 = arith.constant 0 : index
    %c0_0 = arith.constant 0 : index
    %0 = vector.load %arg1[%c0, %c0_0] : memref<8x32xf32, #tpu.memory_space<vmem>>, vector<8x32xf32>
    %1 = arith.truncf %0 : vector<8x32xf32> to vector<8x32xbf16>
    %c0_1 = arith.constant 0 : index
    %c0_2 = arith.constant 0 : index
    %2 = vector.load %arg10[%c0_1, %c0_2] : memref<8x48xbf16, #tpu.memory_space<vmem>>, vector<8x32xbf16>
    tpu.vector_store %arg10[%c0_1, %c0_2], %1 {strides = array<i32>} : memref<8x48xbf16, #tpu.memory_space<vmem>>, vector<8x32xbf16>,
    %c0_3 = arith.constant 0 : index
    %c0_4 = arith.constant 0 : index
    %3 = vector.load %arg2[%c0_3, %c0_4] : memref<8x16xf32, #tpu.memory_space<vmem>>, vector<8x16xf32>
    %4 = arith.truncf %3 : vector<8x16xf32> to vector<8x16xbf16>
    %c0_5 = arith.constant 0 : index
    %c32 = arith.constant 32 : index
    %5 = vector.load %arg10[%c0_5, %c32] : memref<8x48xbf16, #tpu.memory_space<vmem>>, vector<8x16xbf16>
    tpu.vector_store %arg10[%c0_5, %c32], %4 {strides = array<i32>} : memref<8x48xbf16, #tpu.memory_space<vmem>>, vector<8x16xbf16>,
    %c0_6 = arith.constant 0 : index
    %c0_7 = arith.constant 0 : index
    %6 = vector.load %arg3[%c0_6, %c0_7] : memref<48x64xbf16, #tpu.memory_space<vmem>>, vector<48x64xbf16>
    %c0_8 = arith.constant 0 : index
    %c0_9 = arith.constant 0 : index
    %7 = vector.load %arg4[%c0_8, %c0_9] : memref<1x64xf32, #tpu.memory_space<vmem>>, vector<1x64xf32>
    %c0_10 = arith.constant 0 : index
    %c0_11 = arith.constant 0 : index
    %8 = vector.load %arg10[%c0_10, %c0_11] : memref<8x48xbf16, #tpu.memory_space<vmem>>, vector<8x48xbf16>
    %cst = arith.constant dense<0.000000e+00> : vector<8x64xf32>
    %9 = tpu.matmul %8, %6, %cst {dimension_numbers = #tpu.dot_dimension_numbers<[1], [0], [0], [1], [0, 0, 1, 1], [], []>} : vector<8x48xbf16>, vector<48x64xbf16>, vector<8x64xf32> -> vector<8x64xf32>
    %10 = vector.broadcast %7 : vector<1x64xf32> to vector<8x64xf32>
    %11 = arith.addf %9, %10 : vector<8x64xf32>
    %cst_12 = arith.constant 0.000000e+00 : f32
    %12 = vector.broadcast %cst_12 : f32 to vector<8x64xf32>
    %13 = arith.maximumf %11, %12 : vector<8x64xf32>
    %c0_13 = arith.constant 0 : index
    %c0_14 = arith.constant 0 : index
    %14 = vector.load %arg5[%c0_13, %c0_14] : memref<64x32xbf16, #tpu.memory_space<vmem>>, vector<64x32xbf16>
    %c0_15 = arith.constant 0 : index
    %c0_16 = arith.constant 0 : index
    %15 = vector.load %arg6[%c0_15, %c0_16] : memref<1x32xf32, #tpu.memory_space<vmem>>, vector<1x32xf32>
    %16 = arith.truncf %13 : vector<8x64xf32> to vector<8x64xbf16>
    %cst_17 = arith.constant dense<0.000000e+00> : vector<8x32xf32>
    %17 = tpu.matmul %16, %14, %cst_17 {dimension_numbers = #tpu.dot_dimension_numbers<[1], [0], [0], [1], [0, 0, 1, 1], [], []>} : vector<8x64xbf16>, vector<64x32xbf16>, vector<8x32xf32> -> vector<8x32xf32>
    %18 = vector.broadcast %15 : vector<1x32xf32> to vector<8x32xf32>
    %19 = arith.addf %17, %18 : vector<8x32xf32>
    %cst_18 = arith.constant 0.000000e+00 : f32
    %20 = vector.broadcast %cst_18 : f32 to vector<8x32xf32>
    %21 = arith.maximumf %19, %20 : vector<8x32xf32>
    %c0_19 = arith.constant 0 : index
    %c0_20 = arith.constant 0 : index
    %22 = vector.load %arg7[%c0_19, %c0_20] : memref<1x32xf32, #tpu.memory_space<vmem>>, vector<1x32xf32>
    %c0_21 = arith.constant 0 : index
    %c0_22 = arith.constant 0 : index
    %23 = vector.load %arg8[%c0_21, %c0_22] : memref<1x1xf32, #tpu.memory_space<vmem>>, vector<1x1xf32>
    %cst_23 = arith.constant dense<0.000000e+00> : vector<1x8xf32>
    %24 = tpu.matmul %22, %21, %cst_23 {dimension_numbers = #tpu.dot_dimension_numbers<[1], [1], [0], [0], [0, 0, 1, 0], [], []>} : vector<1x32xf32>, vector<8x32xf32>, vector<1x8xf32> -> vector<1x8xf32>
    %25 = vector.broadcast %23 : vector<1x1xf32> to vector<1x8xf32>
    %26 = arith.addf %24, %25 : vector<1x8xf32>
    %c0_24 = arith.constant 0 : index
    %c0_25 = arith.constant 0 : index
    %27 = vector.load %arg9[%c0_24, %c0_25] : memref<1x8xf32, #tpu.memory_space<vmem>>, vector<1x8xf32>
    tpu.vector_store %arg9[%c0_24, %c0_25], %26 {strides = array<i32>} : memref<1x8xf32, #tpu.memory_space<vmem>>, vector<1x8xf32>,
    return
  }
  func.func @transform_0(%arg0: i32) -> (i32, i32) {
    %c0_i32 = arith.constant 0 : i32
    %c0_i32_0 = arith.constant 0 : i32
    return %arg0, %c0_i32 : i32, i32
  }
  func.func @transform_1(%arg0: i32) -> (i32, i32) {
    %c0_i32 = arith.constant 0 : i32
    %c0_i32_0 = arith.constant 0 : i32
    return %arg0, %c0_i32 : i32, i32
  }
  func.func @transform_2(%arg0: i32) -> (i32, i32) {
    %c0_i32 = arith.constant 0 : i32
    %c0_i32_0 = arith.constant 0 : i32
    %c0_i32_1 = arith.constant 0 : i32
    return %c0_i32, %c0_i32_0 : i32, i32
  }
  func.func @transform_3(%arg0: i32) -> (i32, i32) {
    %c0_i32 = arith.constant 0 : i32
    %c0_i32_0 = arith.constant 0 : i32
    %c0_i32_1 = arith.constant 0 : i32
    return %c0_i32, %c0_i32_0 : i32, i32
  }
  func.func @transform_4(%arg0: i32) -> (i32, i32) {
    %c0_i32 = arith.constant 0 : i32
    %c0_i32_0 = arith.constant 0 : i32
    %c0_i32_1 = arith.constant 0 : i32
    return %c0_i32, %c0_i32_0 : i32, i32
  }
  func.func @transform_5(%arg0: i32) -> (i32, i32) {
    %c0_i32 = arith.constant 0 : i32
    %c0_i32_0 = arith.constant 0 : i32
    %c0_i32_1 = arith.constant 0 : i32
    return %c0_i32, %c0_i32_0 : i32, i32
  }
  func.func @transform_6(%arg0: i32) -> (i32, i32) {
    %c0_i32 = arith.constant 0 : i32
    %c0_i32_0 = arith.constant 0 : i32
    %c0_i32_1 = arith.constant 0 : i32
    return %c0_i32, %c0_i32_0 : i32, i32
  }
  func.func @transform_7(%arg0: i32) -> (i32, i32) {
    %c0_i32 = arith.constant 0 : i32
    %c0_i32_0 = arith.constant 0 : i32
    %c0_i32_1 = arith.constant 0 : i32
    return %c0_i32, %c0_i32_0 : i32, i32
  }
  func.func @transform_8(%arg0: i32) -> (i32, i32) {
    %c0_i32 = arith.constant 0 : i32
    %c0_i32_0 = arith.constant 0 : i32
    return %c0_i32, %arg0 : i32, i32
  }
}

</mosaic_0001>

<bundles_post_ra>
// kernel: tpu_custom_call.1
= control target key start
LH: loop header
LB: loop body
LE: loop exit
PB: predicated region body
PF: predicated region fallthrough
CT: control target
= control target key end

     0   :  { %s507_s0 = inlined_call_operand.vmem [shape: f32[8,32], index: 0, kind: input, shape index: {}]   ;;  %s508_s1 = inlined_call_operand.vmem [shape: f32[8,16], index: 1, kind: input, shape index: {}]   ;;  %s509_s2 = inlined_call_operand.vmem [shape: bf16[48,64], index: 2, kind: input, shape index: {}]   ;;  %s510_s3 = inlined_call_operand.vmem [shape: f32[1,64], index: 3, kind: input, shape index: {}]   ;;  %s511_s4 = inlined_call_operand.vmem [shape: bf16[64,32], index: 4, kind: input, shape index: {}]   ;;  %s512_s5 = inlined_call_operand.vmem [shape: f32[1,32], index: 5, kind: input, shape index: {}]   ;;  %s513_s6 = inlined_call_operand.vmem [shape: f32[1,32], index: 6, kind: input, shape index: {}]   ;;  %s514_s7 = inlined_call_operand.<no memory space> [shape: f32[1,1], index: 7, kind: input, shape index: {}]   ;;  %s515_s8 = inlined_call_operand.hbm [shape: f32[1,8], index: 8, kind: output, shape index: {}]  }
   0x1   :  { %v13_v0 = vstv %s514_s7 }
   0x2   :  { %14 = vst [vmem:[#allocation3] sm:$0x1] %v13_v0 }
   0x3   :  { %v37_v1 = vld [vmem:[%s508_s1] sm:$0xff]  ;;  %v403_v4 = vmov 0.0   ;;  %vm35_vm0 = vcmask 257024   ;;  %v373_v6 = vld [vmem:[%s509_s2 + $0x8] sm:$0xff]   ;;  %s404_s1 = smov 32   ;;  %vm405_vm1 = vmmov 0  }
   0x4   :  { %v372_v2 = vld [vmem:[%s509_s2] sm:$0xff]   ;;  %v327_v3 = vpack.c.bf16 %v37_v1, %v37_v1  ;;  %339 = vmatprep.subr.bf16.mxu0 %v403_v4  ;;  %349 = vmatprep.subr.bf16.mxu1 %v403_v4  ;;  %v374_v9 = vld [vmem:[%s509_s2 + $0x10] sm:$0xff]   ;;  %v376_v10 = vld [vmem:[%s511_s4 + $0x8] sm:$0xff]  }
   0x5   :  { %v33_v5 = vld [vmem:[%s507_s0] sm:$0xff]  ;;  %340 = vmatpush3.bf16.msra.mxu0 %v372_v2  ;;  %345 = vmatprep.mubr.msk.bf16.mxu0 %vm405_vm1, %v403_v4 }
   0x6   :  { %v34_v7 = vpack.c.bf16 %v33_v5, %v33_v5  ;;  %42 = vrot.lane.b32.xlu0 %v327_v3, %s404_s1  ;;  %341 = vmatprep.subr.bf16.mxu0 %v403_v4  ;;  %v375_v8 = vld [vmem:[%s511_s4] sm:$0xff]  }
   0x7   :  { %357 = vmatprep.mubr.msk.bf16.mxu1 %vm405_vm1, %v403_v4  ;;  %350 = vmatpush3.bf16.msra.mxu1 %v375_v8 }
   0x8   :  { %36 = vst.msk [vmem:[#allocation2] sm:$0xf] %vm35_vm0, %v34_v7  ;;  %351 = vmatprep.subr.bf16.mxu1 %v403_v4 }
   0x9   :  { %342 = vmatpush3.bf16.msra.mxu0 %v373_v6 }
   0xa   :  { %343 = vmatprep.subr.bf16.mxu0 %v403_v4 }
   0xb   :  { %15 = vsyncpa [#allocation5], 0  ;;  %352 = vmatpush3.bf16.msra.mxu1 %v376_v10  ;;  %vm45_vm2 = vcmask 388352   ;;  %vm79_vm3 = vcmask 392192   ;;  %v377_v13 = vld [vmem:[%s511_s4 + $0x10] sm:$0xff]   ;;  %v378_v14 = vld [vmem:[%s511_s4 + $0x18] sm:$0xff]   ;;  %v216_v33 = vlaneseq }
   0xc   :  { %353 = vmatprep.subr.bf16.mxu1 %v403_v4  ;;  %v314_v15 = vld [vmem:[%s510_s3] ss:$0 sm:$0xff]  ;;  %vm164_vm4 = vcmask 523264   ;;  %v210_v23 = vld [vmem:[#allocation3] sm:$0x1]  ;;  %v406_v24 = vmov 0  }
   0xd   :  { %344 = vmatpush3.bf16.msra.mxu0 %v374_v9  ;;  %371 = vset.pattern.permute.xlu0 %v406_v24  ;;  %v319_v25 = vld [vmem:[%s512_s5] ss:$0 sm:$0xff]  ;;  %vm220_vm5 = vcmask 261120   ;;  %v217_v34 = vshrl.u32 %v216_v33, 7  ;;  %s407_s26 = smov [#allocation4]   ;;  %vm297_vm6 = vcmask 57344  }
   0xe   :  { %361 = vmatprep.subr.mxu0 %v403_v4  ;;  %213 = vperm.xlu0 %371, %v210_v23   ;;  %v209_v32 = vld [vmem:[%s513_s6] sm:$0x1]  ;;  %s305_s5 = sshll.u32 %s407_s26, 4  ;;  %s306_s5 = int_to_ptr.vmem [resolvable:$true] %s305_s5 }
   0xf   :  { %354 = vmatpush3.bf16.msra.mxu1 %v377_v13  ;;  %v218_v35 = vsub.s32 0, %v217_v34  ;;  %s379_s27 = scalar_lea.vmem %s306_s5, 16  ;;  %s383_s28 = scalar_lea.vmem %s306_s5, 32 }
  0x10   :  { %355 = vmatprep.subr.bf16.mxu1 %v403_v4  ;;  %p380_p0 = scmp.ne.s32.totalorder %s306_s5, %s379_s27  ;;  %p384_p1 = scmp.lt.s32.totalorder %s306_s5, %s306_s5 }
  0x11   :  { %p385_p2 = scmp.lt.s32.totalorder %s383_s28, %s379_s27 }
  0x13   :  { %356 = vmatpush3.bf16.msra.mxu1 %v378_v14  ;;  %p386_p3 = por %p385_p2, %p384_p1 }
  0x15   :  { %p387_p4 = pnand %p386_p3, %p380_p0 }
  0x78   :  { %v43_v11 = vpop.permute.xlu0 %42 }
  0x79   :  { %46 = vst.msk [vmem:[#allocation2] sm:$0xf] %vm45_vm2, %v43_v11 }
  0x80   :  { %v54_v12 = vld [vmem:[#allocation2] sm:$0xf] }
  0x81   :  { %346 = vmatmul.mubr.msk.bf16.vlgmr.msra.gmra.mrb[0].mxu0 %vm79_vm3, %v54_v12 }
  0x82   :  { %363 = vmatprep.mubr.msk.f32.mxu0 %vm405_vm1, %v403_v4 }
  0x8d   :  { %v214_v36 = vpop.permute.xlu0 %213 }
  0x8e   :  { %v219_v37 = vrot.slane %v214_v36, %v218_v35 }
 0x154   :  { %v117_v16 = vpop.f32.mrb[0].mxu0 }
 0x155   :  { %v118_v17 = vadd.f32 %v314_v15, %v117_v16  ;;  %v347_v18 = vpop.f32.mrb[1].mxu0 }
 0x156   :  { %v120_v19 = vpop.f32.mrb[2].mxu0 }
 0x157   :  { %v123_v20 = vmax.f32 %v118_v17, 0.0  ;;  %v348_v21 = vpop.f32.mrb[3].mxu0 }
 0x159   :  { %v133_v22 = vpack.c.bf16 %v123_v20, %v123_v20 }
 0x15b   :  { %358 = vmatmul.mubr.msk.bf16.vlgmr.msra.gmra.mrb[0].mxu1 %vm164_vm4, %v133_v22 }
 0x22e   :  { %v202_v26 = vpop.f32.mrb[0].mxu1 }
 0x22f   :  { %v203_v27 = vadd.f32 %v319_v25, %v202_v26  ;;  %v359_v28 = vpop.f32.mrb[1].mxu1 }
 0x230   :  { %v205_v29 = vpop.f32.mrb[2].mxu1 }
 0x231   :  { %v208_v30 = vmax.f32 %v203_v27, 0.0  ;;  %v360_v31 = vpop.f32.mrb[3].mxu1 }
 0x233   :  { %362 = vmatpush3.xpose.msk.msra.mxu0 %vm220_vm5, %v208_v30 }
 0x236   :  { %364 = vmatmul.mubr.msk.f32.vlgmr.msra.gmra.mrb[4].mxu0 %vm220_vm5, %v209_v32 }
 0x309   :  { %v293_v38 = vpop.f32.mrb[4].mxu0 }
 0x30a   :  { %v294_v39 = vadd.f32 %v293_v38, %v219_v37  ;;  %v365_v40 = vpop.f32.mrb[5].mxu0 }
 0x30c   :  { %298 = vst.msk [vmem:[#allocation4] sm:$0x1] %vm297_vm6, %v294_v39 }
 0x30d   :  { %390 = shalt.err (!%p387_p4)
}
 0x30e   :  { %s391_s30 = scalar_lea.hbm %s515_s8, 16 }
 0x30f   :  { %p392_p5 = scmp.ne.s32.totalorder %s515_s8, %s391_s30  ;;  %p395_p6 = scmp.lt.u32.totalorder %s391_s30, %s515_s8 }
 0x311   :  { %p397_p7 = pnand %p395_p6, %p392_p5 }
 0x313   :  { %400 = shalt.err (!%p397_p7)
}
 0x314   :  { %308 = dma.vmem_to_hbm [thread:$0]  %s306_s5, 16, %s515_s8, [#allocation5]  }
 0x315   :  { %401 = dma.done.wait [#allocation5], 16  }
 0x316   :  { %402 = vsyncadd [#allocation5], 4294967280 }
 0x317   :  { %312 = vsyncpa [#allocation5], 1 }

</bundles_post_ra>
